<compile_context>
chip_gen: v6e
topology: v6e:2x2x1
jax: 0.10.0
libtpu: 0.0.40
codegen_flags: <defaults>
</compile_context>

<pallas_src>
import functools
import math

import jax
import jax.numpy as jnp
from jax.experimental import pallas as pl
from jax.experimental.pallas import tpu as pltpu


# --------------------------------------------------------------------------- kernel
def _disc_kernel(*refs, n_streams, second_on_vpu, mxu_dtype):
    """refs = (x_0..x_{n-1}, w1, b1, w2, b2, o_0..o_{n-1}).

    x_i : (TB, in_feats)               o_i : (TB, out_feats)
    w1  : (in_feats, hidden)           b1  : (1, hidden)
    w2  : (1, hidden)          if second_on_vpu (out_feats == 1)
          (hidden, out_feats)  otherwise
    b2  : (1, out_feats)
    """
    x_refs = refs[:n_streams]
    w1_ref, b1_ref, w2_ref, b2_ref = refs[n_streams:n_streams + 4]
    o_refs = refs[n_streams + 4:]

    w1 = w1_ref[...].astype(mxu_dtype)            # cast once, reused for both streams
    b1 = b1_ref[...]                              # elementwise math stays f32
    b2 = b2_ref[...]
    w2_vpu = w2_ref[...] if second_on_vpu else None
    w2_mxu = None if second_on_vpu else w2_ref[...].astype(mxu_dtype)

    for x_ref, o_ref in zip(x_refs, o_refs):
        # ---- layer 1: MXU matmul (f32 accumulate) + LeakyReLU(0.2) on the VPU ----
        x = x_ref[...].astype(mxu_dtype)
        h = jnp.dot(x, w1, preferred_element_type=jnp.float32) + b1
        h = jnp.where(h >= 0, h, 0.2 * h)

        # ---- layer 2 ----
        if second_on_vpu:
            # out_feats == 1: an [TB,H] x [H,1] MXU matmul wastes the array and the
            # MRF/MRB round trip; VPU multiply + XLU lane-reduce uses idle slots and
            # keeps the result at (TB, 1) -- no lane-padded slab.
            y = jnp.sum(h * w2_vpu, axis=-1, keepdims=True) + b2
        else:
            y = jnp.dot(h.astype(mxu_dtype), w2_mxu,
                        preferred_element_type=jnp.float32) + b2
        y = jnp.where(y >= 0, y, 0.2 * y)

        # ---- exact, numerically-stable sigmoid (exp argument is always <= 0) ----
        z = jnp.exp(-jnp.abs(y))
        o_ref[...] = jnp.where(y >= 0, 1.0 / (1.0 + z), z / (1.0 + z)).astype(o_ref.dtype)


# -------------------------------------------------------------------------- wrapper
def _pick_block(batch):
    # Full-dim block for small batches (grid=(1,), no padding, always layout-legal).
    # Otherwise a fixed 256-row tile: multiple of 8 sublanes (f32), 256-aligned for
    # the v6e/v7x 2x256^2 MXU, modest VMEM footprint, and it gives the pipeline
    # several grid steps so the x HBM->VMEM DMA hides behind compute.
    return batch if batch <= 256 else 256


def _discriminator_pallas(xs, w1, b1, w2k, b2, *, second_on_vpu, mxu_bf16):
    batch, in_feats = xs[0].shape
    out_feats = b2.shape[1]
    n = len(xs)
    block_b = _pick_block(batch)

    kernel = functools.partial(
        _disc_kernel, n_streams=n, second_on_vpu=second_on_vpu,
        mxu_dtype=jnp.bfloat16 if mxu_bf16 else jnp.float32)

    x_spec = pl.BlockSpec((block_b, in_feats), lambda i: (i, 0))
    o_spec = pl.BlockSpec((block_b, out_feats), lambda i: (i, 0))
    # Grid-invariant weights/biases: whole-array VMEM residents -> DMA'd from HBM
    # once and NOT double-buffered (important for the v7x 64 MiB VMEM budget).
    w_spec = pl.BlockSpec(memory_space=pltpu.MemorySpace.VMEM)

    return pl.pallas_call(
        kernel,
        grid=(pl.cdiv(batch, block_b),),          # ragged last tile handled by masking
        in_specs=[x_spec] * n + [w_spec] * 4,
        out_specs=[o_spec] * n,
        out_shape=[jax.ShapeDtypeStruct((batch, out_feats), x.dtype) for x in xs],
        compiler_params=pltpu.CompilerParams(
            dimension_semantics=("parallel",),
            # Enough for 256-row tiles with production-sized hidden dims; above the
            # 16 MiB (v5e) / 32 MiB (v6e/v7x) scoped defaults, below v7x's 64 MiB
            # physical VMEM.
            vmem_limit_bytes=48 * 1024 * 1024,
        ),
    )(*xs, w1, b1, w2k, b2)


@functools.partial(jax.jit, static_argnames=("mxu_bf16",))
def discriminator_forward(pos, neg, params, mxu_bf16=None):
    """Fused forward pass of the discriminator on both pos and neg inputs."""
    w1, b1, w2, b2 = params
    in_feats, hidden = w1.shape
    out_feats = w2.shape[1]
    if mxu_bf16 is None:
        # bf16 at the MXU only pays (and is only worth the rounding) once layer 1 is
        # actually MXU-bound; tiny layers stay in f32.
        mxu_bf16 = in_feats >= 256 and hidden >= 256

    second_on_vpu = out_feats == 1
    w2k = w2.T if second_on_vpu else w2          # (1, hidden) for the VPU path

    common = dict(second_on_vpu=second_on_vpu, mxu_bf16=mxu_bf16)
    if pos.shape[0] == neg.shape[0]:
        # Common GAN case: one launch, one pos tile + one neg tile per grid step,
        # weights read HBM->VMEM exactly once.  No concat / pad copies.
        pos_out, neg_out = _discriminator_pallas([pos, neg], w1, b1, w2k, b2, **common)
    else:
        # Unequal batches: two launches, still no concat / padding copies.
        (pos_out,) = _discriminator_pallas([pos], w1, b1, w2k, b2, **common)
        (neg_out,) = _discriminator_pallas([neg], w1, b1, w2k, b2, **common)
    return pos_out, neg_out


# --------------------------------------------------------------------- params / ref
def init_params(key, in_feats, hidden_feats, out_feats=1, dtype=jnp.float32):
    """Mimics PyTorch nn.Linear default init (uniform +/- 1/sqrt(fan_in))."""
    k1, k2, k3, k4 = jax.random.split(key, 4)
    lim1 = 1.0 / math.sqrt(in_feats)
    lim2 = 1.0 / math.sqrt(hidden_feats)
    w1 = jax.random.uniform(k1, (in_feats, hidden_feats), dtype, -lim1, lim1)
    b1 = jax.random.uniform(k2, (1, hidden_feats), dtype, -lim1, lim1)
    w2 = jax.random.uniform(k3, (hidden_feats, out_feats), dtype, -lim2, lim2)
    b2 = jax.random.uniform(k4, (1, out_feats), dtype, -lim2, lim2)
    return w1, b1, w2, b2


def _reference(x, params):
    w1, b1, w2, b2 = params
    h = x @ w1 + b1
    h = jnp.where(h >= 0, h, 0.2 * h)
    y = h @ w2 + b2
    y = jnp.where(y >= 0, y, 0.2 * y)
    return jax.nn.sigmoid(y)


# --------------------------------------------------------------------------- main
if __name__ == "__main__":
    key = jax.random.PRNGKey(0)

    def check(pos, neg, params, mxu_bf16, atol):
        pos_out, neg_out = discriminator_forward(pos, neg, params, mxu_bf16=mxu_bf16)
        jax.block_until_ready((pos_out, neg_out))
        ref_p, ref_n = _reference(pos, params), _reference(neg, params)
        assert pos_out.shape == ref_p.shape and neg_out.shape == ref_n.shape
        assert jnp.allclose(pos_out, ref_p, atol=atol), \
            float(jnp.max(jnp.abs(pos_out - ref_p)))
        assert jnp.allclose(neg_out, ref_n, atol=atol), \
            float(jnp.max(jnp.abs(neg_out - ref_n)))

    # 1) tiny GAN-style case: equal batches, out_feats=1, f32 path, grid=(1,)
    k1, k2, k3, key = jax.random.split(key, 4)
    params_a = init_params(k3, in_feats=32, hidden_feats=32, out_feats=1)
    pos_a = jax.random.normal(k1, (8, 32), jnp.float32)
    neg_a = jax.random.normal(k2, (8, 32), jnp.float32)
    check(pos_a, neg_a, params_a, mxu_bf16=False, atol=1e-5)

    # 2) larger equal-batch case: multi-step grid with a ragged last tile + bf16 MXU path
    k1, k2, k3, key = jax.random.split(key, 4)
    params_b = init_params(k3, in_feats=64, hidden_feats=128, out_feats=1)
    pos_b = jax.random.normal(k1, (300, 64), jnp.float32)
    neg_b = jax.random.normal(k2, (300, 64), jnp.float32)
    check(pos_b, neg_b, params_b, mxu_bf16=True, atol=2e-2)

    # 3) unequal batches + out_feats > 1: exercises the single-stream fallback and the
    #    MXU second-layer path
    k1, k2, k3, key = jax.random.split(key, 4)
    params_c = init_params(k3, in_feats=32, hidden_feats=32, out_feats=3)
    pos_c = jax.random.normal(k1, (8, 32), jnp.float32)
    neg_c = jax.random.normal(k2, (12, 32), jnp.float32)
    check(pos_c, neg_c, params_c, mxu_bf16=False, atol=1e-5)

    print("KERNEL_OK")
</pallas_src>

<mosaic_0001>
module attributes {stable_mosaic.version = 11 : i64} {
  func.func @_disc_kernel(%arg0: i32, %arg1: memref<8x32xf32, #tpu.memory_space<vmem>>, %arg2: memref<8x32xf32, #tpu.memory_space<vmem>>, %arg3: memref<32x32xf32, #tpu.memory_space<vmem>>, %arg4: memref<1x32xf32, #tpu.memory_space<vmem>>, %arg5: memref<1x32xf32, #tpu.memory_space<vmem>>, %arg6: memref<1x1xf32, #tpu.memory_space<vmem>>, %arg7: memref<8x1xf32, #tpu.memory_space<vmem>>, %arg8: memref<8x1xf32, #tpu.memory_space<vmem>>) attributes {dimension_semantics = [#tpu.dimension_semantics<parallel>], iteration_bounds = array<i64: 1>, scalar_prefetch = 0 : i64, scratch_operands = 0 : i64, tpu.core_type = #tpu.core_type<tc>, window_params = [{transform_indices = @transform_0, window_bounds = array<i64: 8, 32>}, {transform_indices = @transform_1, window_bounds = array<i64: 8, 32>}, {pipeline_mode = #tpu.pipeline_mode<synchronous>, transform_indices = @transform_2, window_bounds = array<i64: 32, 32>}, {pipeline_mode = #tpu.pipeline_mode<synchronous>, transform_indices = @transform_3, window_bounds = array<i64: 1, 32>}, {pipeline_mode = #tpu.pipeline_mode<synchronous>, transform_indices = @transform_4, window_bounds = array<i64: 1, 32>}, {pipeline_mode = #tpu.pipeline_mode<synchronous>, transform_indices = @transform_5, window_bounds = array<i64: 1, 1>}, {transform_indices = @transform_6, window_bounds = array<i64: 8, 1>}, {transform_indices = @transform_7, window_bounds = array<i64: 8, 1>}]} {
    %c0 = arith.constant 0 : index
    %c0_0 = arith.constant 0 : index
    %0 = vector.load %arg3[%c0, %c0_0] : memref<32x32xf32, #tpu.memory_space<vmem>>, vector<32x32xf32>
    %c0_1 = arith.constant 0 : index
    %c0_2 = arith.constant 0 : index
    %1 = vector.load %arg4[%c0_1, %c0_2] : memref<1x32xf32, #tpu.memory_space<vmem>>, vector<1x32xf32>
    %c0_3 = arith.constant 0 : index
    %c0_4 = arith.constant 0 : index
    %2 = vector.load %arg6[%c0_3, %c0_4] : memref<1x1xf32, #tpu.memory_space<vmem>>, vector<1x1xf32>
    %c0_5 = arith.constant 0 : index
    %c0_6 = arith.constant 0 : index
    %3 = vector.load %arg5[%c0_5, %c0_6] : memref<1x32xf32, #tpu.memory_space<vmem>>, vector<1x32xf32>
    %c0_7 = arith.constant 0 : index
    %c0_8 = arith.constant 0 : index
    %4 = vector.load %arg1[%c0_7, %c0_8] : memref<8x32xf32, #tpu.memory_space<vmem>>, vector<8x32xf32>
    %cst = arith.constant dense<0.000000e+00> : vector<8x32xf32>
    %5 = tpu.matmul %4, %0, %cst {dimension_numbers = #tpu.dot_dimension_numbers<[1], [0], [0], [1], [0, 0, 1, 1], [], []>} : vector<8x32xf32>, vector<32x32xf32>, vector<8x32xf32> -> vector<8x32xf32>
    %6 = vector.broadcast %1 : vector<1x32xf32> to vector<8x32xf32>
    %7 = arith.addf %5, %6 : vector<8x32xf32>
    %cst_9 = arith.constant 0.000000e+00 : f32
    %8 = vector.broadcast %cst_9 : f32 to vector<8x32xf32>
    %9 = arith.cmpf oge, %7, %8 : vector<8x32xf32>
    %cst_10 = arith.constant 2.000000e-01 : f32
    %10 = vector.broadcast %cst_10 : f32 to vector<8x32xf32>
    %11 = arith.mulf %10, %7 : vector<8x32xf32>
    %12 = arith.select %9, %7, %11 : vector<8x32xi1>, vector<8x32xf32>
    %13 = vector.broadcast %3 : vector<1x32xf32> to vector<8x32xf32>
    %14 = arith.mulf %12, %13 : vector<8x32xf32>
    %cst_11 = arith.constant dense<0.000000e+00> : vector<8xf32>
    %15 = vector.multi_reduction <add>, %14, %cst_11 [1] : vector<8x32xf32> to vector<8xf32>
    %16 = vector.shape_cast %15 : vector<8xf32> to vector<8x1xf32>
    %17 = vector.broadcast %2 : vector<1x1xf32> to vector<8x1xf32>
    %18 = arith.addf %16, %17 : vector<8x1xf32>
    %cst_12 = arith.constant 0.000000e+00 : f32
    %19 = vector.broadcast %cst_12 : f32 to vector<8x1xf32>
    %20 = arith.cmpf oge, %18, %19 : vector<8x1xf32>
    %cst_13 = arith.constant 2.000000e-01 : f32
    %21 = vector.broadcast %cst_13 : f32 to vector<8x1xf32>
    %22 = arith.mulf %21, %18 : vector<8x1xf32>
    %23 = arith.select %20, %18, %22 : vector<8x1xi1>, vector<8x1xf32>
    %24 = math.absf %23 : vector<8x1xf32>
    %cst_14 = arith.constant 0.000000e+00 : f32
    %25 = vector.broadcast %cst_14 : f32 to vector<8x1xf32>
    %26 = arith.subf %25, %24 : vector<8x1xf32>
    %27 = math.exp %26 : vector<8x1xf32>
    %cst_15 = arith.constant 0.000000e+00 : f32
    %28 = vector.broadcast %cst_15 : f32 to vector<8x1xf32>
    %29 = arith.cmpf oge, %23, %28 : vector<8x1xf32>
    %cst_16 = arith.constant 1.000000e+00 : f32
    %30 = vector.broadcast %cst_16 : f32 to vector<8x1xf32>
    %31 = arith.addf %30, %27 : vector<8x1xf32>
    %cst_17 = arith.constant 1.000000e+00 : f32
    %32 = vector.broadcast %cst_17 : f32 to vector<8x1xf32>
    %33 = arith.divf %32, %31 : vector<8x1xf32>
    %cst_18 = arith.constant 1.000000e+00 : f32
    %34 = vector.broadcast %cst_18 : f32 to vector<8x1xf32>
    %35 = arith.addf %34, %27 : vector<8x1xf32>
    %36 = arith.divf %27, %35 : vector<8x1xf32>
    %37 = arith.select %29, %33, %36 : vector<8x1xi1>, vector<8x1xf32>
    %c0_19 = arith.constant 0 : index
    %c0_20 = arith.constant 0 : index
    %38 = vector.load %arg7[%c0_19, %c0_20] : memref<8x1xf32, #tpu.memory_space<vmem>>, vector<8x1xf32>
    tpu.vector_store %arg7[%c0_19, %c0_20], %37 {strides = array<i32>} : memref<8x1xf32, #tpu.memory_space<vmem>>, vector<8x1xf32>,
    %c0_21 = arith.constant 0 : index
    %c0_22 = arith.constant 0 : index
    %39 = vector.load %arg2[%c0_21, %c0_22] : memref<8x32xf32, #tpu.memory_space<vmem>>, vector<8x32xf32>
    %cst_23 = arith.constant dense<0.000000e+00> : vector<8x32xf32>
    %40 = tpu.matmul %39, %0, %cst_23 {dimension_numbers = #tpu.dot_dimension_numbers<[1], [0], [0], [1], [0, 0, 1, 1], [], []>} : vector<8x32xf32>, vector<32x32xf32>, vector<8x32xf32> -> vector<8x32xf32>
    %41 = vector.broadcast %1 : vector<1x32xf32> to vector<8x32xf32>
    %42 = arith.addf %40, %41 : vector<8x32xf32>
    %cst_24 = arith.constant 0.000000e+00 : f32
    %43 = vector.broadcast %cst_24 : f32 to vector<8x32xf32>
    %44 = arith.cmpf oge, %42, %43 : vector<8x32xf32>
    %cst_25 = arith.constant 2.000000e-01 : f32
    %45 = vector.broadcast %cst_25 : f32 to vector<8x32xf32>
    %46 = arith.mulf %45, %42 : vector<8x32xf32>
    %47 = arith.select %44, %42, %46 : vector<8x32xi1>, vector<8x32xf32>
    %48 = vector.broadcast %3 : vector<1x32xf32> to vector<8x32xf32>
    %49 = arith.mulf %47, %48 : vector<8x32xf32>
    %cst_26 = arith.constant dense<0.000000e+00> : vector<8xf32>
    %50 = vector.multi_reduction <add>, %49, %cst_26 [1] : vector<8x32xf32> to vector<8xf32>
    %51 = vector.shape_cast %50 : vector<8xf32> to vector<8x1xf32>
    %52 = vector.broadcast %2 : vector<1x1xf32> to vector<8x1xf32>
    %53 = arith.addf %51, %52 : vector<8x1xf32>
    %cst_27 = arith.constant 0.000000e+00 : f32
    %54 = vector.broadcast %cst_27 : f32 to vector<8x1xf32>
    %55 = arith.cmpf oge, %53, %54 : vector<8x1xf32>
    %cst_28 = arith.constant 2.000000e-01 : f32
    %56 = vector.broadcast %cst_28 : f32 to vector<8x1xf32>
    %57 = arith.mulf %56, %53 : vector<8x1xf32>
    %58 = arith.select %55, %53, %57 : vector<8x1xi1>, vector<8x1xf32>
    %59 = math.absf %58 : vector<8x1xf32>
    %cst_29 = arith.constant 0.000000e+00 : f32
    %60 = vector.broadcast %cst_29 : f32 to vector<8x1xf32>
    %61 = arith.subf %60, %59 : vector<8x1xf32>
    %62 = math.exp %61 : vector<8x1xf32>
    %cst_30 = arith.constant 0.000000e+00 : f32
    %63 = vector.broadcast %cst_30 : f32 to vector<8x1xf32>
    %64 = arith.cmpf oge, %58, %63 : vector<8x1xf32>
    %cst_31 = arith.constant 1.000000e+00 : f32
    %65 = vector.broadcast %cst_31 : f32 to vector<8x1xf32>
    %66 = arith.addf %65, %62 : vector<8x1xf32>
    %cst_32 = arith.constant 1.000000e+00 : f32
    %67 = vector.broadcast %cst_32 : f32 to vector<8x1xf32>
    %68 = arith.divf %67, %66 : vector<8x1xf32>
    %cst_33 = arith.constant 1.000000e+00 : f32
    %69 = vector.broadcast %cst_33 : f32 to vector<8x1xf32>
    %70 = arith.addf %69, %62 : vector<8x1xf32>
    %71 = arith.divf %62, %70 : vector<8x1xf32>
    %72 = arith.select %64, %68, %71 : vector<8x1xi1>, vector<8x1xf32>
    %c0_34 = arith.constant 0 : index
    %c0_35 = arith.constant 0 : index
    %73 = vector.load %arg8[%c0_34, %c0_35] : memref<8x1xf32, #tpu.memory_space<vmem>>, vector<8x1xf32>
    tpu.vector_store %arg8[%c0_34, %c0_35], %72 {strides = array<i32>} : memref<8x1xf32, #tpu.memory_space<vmem>>, vector<8x1xf32>,
    return
  }
  func.func @transform_0(%arg0: i32) -> (i32, i32) {
    %c0_i32 = arith.constant 0 : i32
    %c0_i32_0 = arith.constant 0 : i32
    return %arg0, %c0_i32 : i32, i32
  }
  func.func @transform_1(%arg0: i32) -> (i32, i32) {
    %c0_i32 = arith.constant 0 : i32
    %c0_i32_0 = arith.constant 0 : i32
    return %arg0, %c0_i32 : i32, i32
  }
  func.func @transform_2(%arg0: i32) -> (i32, i32) {
    %c0_i32 = arith.constant 0 : i32
    %c0_i32_0 = arith.constant 0 : i32
    %c0_i32_1 = arith.constant 0 : i32
    return %c0_i32, %c0_i32_0 : i32, i32
  }
  func.func @transform_3(%arg0: i32) -> (i32, i32) {
    %c0_i32 = arith.constant 0 : i32
    %c0_i32_0 = arith.constant 0 : i32
    %c0_i32_1 = arith.constant 0 : i32
    return %c0_i32, %c0_i32_0 : i32, i32
  }
  func.func @transform_4(%arg0: i32) -> (i32, i32) {
    %c0_i32 = arith.constant 0 : i32
    %c0_i32_0 = arith.constant 0 : i32
    %c0_i32_1 = arith.constant 0 : i32
    return %c0_i32, %c0_i32_0 : i32, i32
  }
  func.func @transform_5(%arg0: i32) -> (i32, i32) {
    %c0_i32 = arith.constant 0 : i32
    %c0_i32_0 = arith.constant 0 : i32
    %c0_i32_1 = arith.constant 0 : i32
    return %c0_i32, %c0_i32_0 : i32, i32
  }
  func.func @transform_6(%arg0: i32) -> (i32, i32) {
    %c0_i32 = arith.constant 0 : i32
    %c0_i32_0 = arith.constant 0 : i32
    return %arg0, %c0_i32 : i32, i32
  }
  func.func @transform_7(%arg0: i32) -> (i32, i32) {
    %c0_i32 = arith.constant 0 : i32
    %c0_i32_0 = arith.constant 0 : i32
    return %arg0, %c0_i32 : i32, i32
  }
}

</mosaic_0001>

<bundles_post_ra>
// kernel: discriminator_forward.1
= control target key start
LH: loop header
LB: loop body
LE: loop exit
PB: predicated region body
PF: predicated region fallthrough
CT: control target
= control target key end

     0   :  { %s484_s0 = inlined_call_operand.hbm [shape: f32[8,32], index: 0, kind: input, shape index: {}]   ;;  %s485_s1 = inlined_call_operand.hbm [shape: f32[8,32], index: 1, kind: input, shape index: {}]   ;;  %s486_s2 = inlined_call_operand.hbm [shape: f32[32,32], index: 2, kind: input, shape index: {}]   ;;  %s487_s3 = inlined_call_operand.vmem [shape: f32[1,32], index: 3, kind: input, shape index: {}]   ;;  %s488_s4 = inlined_call_operand.vmem [shape: f32[1,32], index: 4, kind: input, shape index: {}]   ;;  %s489_s5 = inlined_call_operand.<no memory space> [shape: f32[1,1], index: 5, kind: input, shape index: {}]   ;;  %s490_s6 = inlined_call_operand.vmem [shape: f32[8,1], index: 6, kind: output, shape index: {0}]   ;;  %s491_s7 = inlined_call_operand.vmem [shape: f32[8,1], index: 7, kind: output, shape index: {1}]  }
   0x1   :  { %v13_v0 = vstv %s489_s5 }
   0x2   :  { %14 = vst [vmem:[#allocation2] sm:$0x1] %v13_v0 }
   0x3   :  { %15 = vsyncpa [#allocation4], 0 }
   0x4   :  { %16 = vsyncpa [#allocation6], 0  ;;  %s409_s26 = smov [#allocation5]   ;;  %s410_s28 = smov [#allocation3]  }
   0x5   :  { %s33_s27 = sshll.u32 %s409_s26, 4  ;;  %s23_s29 = sshll.u32 %s410_s28, 4  ;;  %s34_s27 = int_to_ptr.vmem [resolvable:$true] %s33_s27  ;;  %s24_s29 = int_to_ptr.vmem [resolvable:$true] %s23_s29 }
   0x6   :  { %s353_s30 = scalar_lea.vmem %s34_s27, 128  ;;  %p358_p1 = scmp.lt.s32.totalorder %s34_s27, %s34_s27 }
   0x7   :  { %p354_p0 = scmp.ne.s32.totalorder %s34_s27, %s353_s30  ;;  %p359_p2 = scmp.lt.s32.totalorder %s353_s30, %s353_s30 }
   0x9   :  { %p360_p3 = por %p359_p2, %p358_p1 }
   0xb   :  { %p361_p4 = pnand %p360_p3, %p354_p0 }
   0xd   :  { %364 = shalt.err (!%p361_p4)
}
   0xe   :  { %36 = dma.hbm_to_vmem [thread:$0]  %s485_s1, 128, %s34_s27, [#allocation6]  }
   0xf   :  { %s373_s5 = scalar_lea.vmem %s24_s29, 128  ;;  %p378_p6 = scmp.lt.s32.totalorder %s24_s29, %s24_s29 }
  0x10   :  { %p374_p5 = scmp.ne.s32.totalorder %s24_s29, %s373_s5  ;;  %p379_p7 = scmp.lt.s32.totalorder %s373_s5, %s373_s5 }
  0x12   :  { %p380_p8 = por %p379_p7, %p378_p6 }
  0x14   :  { %p381_p9 = pnand %p380_p8, %p374_p5 }
  0x16   :  { %384 = shalt.err (!%p381_p9)
}
  0x17   :  { %26 = dma.hbm_to_vmem [thread:$0]  %s484_s0, 128, %s24_s29, [#allocation4]  }
  0x18   :  { %s411_s12 = smov [#allocation7]  }
  0x19   :  { %s42_s13 = sshll.u32 %s411_s12, 4  ;;  %s43_s13 = int_to_ptr.vmem [resolvable:$true] %s42_s13 }
  0x1a   :  { %s393_s14 = scalar_lea.vmem %s43_s13, 512  ;;  %p398_p11 = scmp.lt.s32.totalorder %s43_s13, %s43_s13 }
  0x1b   :  { %p394_p10 = scmp.ne.s32.totalorder %s43_s13, %s393_s14  ;;  %p399_p12 = scmp.lt.s32.totalorder %s393_s14, %s393_s14 }
  0x1d   :  { %p400_p13 = por %p399_p12, %p398_p11 }
  0x1f   :  { %p401_p0 = pnand %p400_p13, %p394_p10 }
  0x21   :  { %404 = shalt.err (!%p401_p0)
}
  0x22   :  { %s412_s1 = smov 128   ;;  %s413_s15 = smov 8  }
  0x23   :  { %48 = dma.hbm_to_vmem [thread:$0]  %s486_s2, 512, %s43_s13, [#allocation6], %s412_s1, %s412_s1, %s413_s15  }
  0x24   :  { %405 = dma.done.wait [#allocation4], 128  }
  0x25   :  { %406 = vsyncadd [#allocation4], 4294967168 }
  0x26   :  { %407 = dma.done.wait [#allocation6], 640  }
  0x27   :  { %408 = vsyncadd [#allocation6], 4294966656  ;;  %v414_v1 = vmov 0.0   ;;  %vm415_vm0 = vmmov 0   ;;  %v67_v2 = vld [vmem:[#allocation7 + $0x18] sm:$0xff]  ;;  %v66_v3 = vld [vmem:[#allocation7 + $0x10] sm:$0xff] }
  0x28   :  { %308 = vmatprep.subr.mxu0 %v414_v1  ;;  %319 = vmatprep.subr.mxu1 %v414_v1  ;;  %v65_v4 = vld [vmem:[#allocation7 + $0x8] sm:$0xff]  ;;  %v64_v5 = vld [vmem:[#allocation7] sm:$0xff]  ;;  %v71_v6 = vld [vmem:[#allocation3] sm:$0xff]  ;;  %vm78_vm1 = vcmask 261120   ;;  %vm185_vm6 = vcmask 7168  }
  0x29   :  { %316 = vmatprep.mubr.msk.f32.mxu0 %vm415_vm0, %v414_v1  ;;  %327 = vmatprep.mubr.msk.f32.mxu1 %vm415_vm0, %v414_v1  ;;  %v187_v7 = vld [vmem:[#allocation5] sm:$0xff]  ;;  %v293_v8 = vld [vmem:[%s487_s3] ss:$0 sm:$0xff] }
  0x2a   :  { %309 = vmatpush3.msra.mxu0 %v67_v2  ;;  %320 = vmatpush3.msra.mxu1 %v67_v2  ;;  %v295_v15 = vld [vmem:[%s488_s4] ss:$0 sm:$0xff] }
  0x2b   :  { %310 = vmatprep.subr.mxu0 %v414_v1  ;;  %321 = vmatprep.subr.mxu1 %v414_v1  ;;  %v296_v24 = vld [vmem:[#allocation2] ss:$0 sm:$0xff] }
  0x2c   :  { %311 = vmatpush3.msra.mxu0 %v66_v3  ;;  %322 = vmatpush3.msra.mxu1 %v66_v3 }
  0x2d   :  { %312 = vmatprep.subr.mxu0 %v414_v1  ;;  %323 = vmatprep.subr.mxu1 %v414_v1 }
  0x2e   :  { %313 = vmatpush3.msra.mxu0 %v65_v4  ;;  %324 = vmatpush3.msra.mxu1 %v65_v4 }
  0x2f   :  { %314 = vmatprep.subr.mxu0 %v414_v1  ;;  %325 = vmatprep.subr.mxu1 %v414_v1 }
  0x30   :  { %315 = vmatpush3.msra.mxu0 %v64_v5  ;;  %326 = vmatpush3.msra.mxu1 %v64_v5 }
  0x31   :  { %317 = vmatmul.mubr.msk.f32.vlgmr.msra.gmra.mxu0 %vm78_vm1, %v71_v6  ;;  %328 = vmatmul.mubr.msk.f32.vlgmr.msra.gmra.mxu1 %vm78_vm1, %v187_v7 }
  0xf1   :  { %v148_v9 = vpop.f32.mrf.mxu0  ;;  %v257_v10 = vpop.f32.mrf.mxu1 }
  0xf2   :  { %v149_v11 = vadd.f32 %v293_v8, %v148_v9  ;;  %v258_v12 = vadd.f32 %v293_v8, %v257_v10 }
  0xf3   :  { %v318_v13 = vpop.f32.mrf.mxu0  ;;  %v329_v14 = vpop.f32.mrf.mxu1 }
  0xf4   :  { %v153_v16 = vmul.f32 0.2, %v149_v11  ;;  %vm261_vm2 = vcmp.ge.f32.partialorder %v258_v12, 0.0  ;;  %v262_v17 = vmul.f32 0.2, %v258_v12  ;;  %vm152_vm3 = vcmp.ge.f32.partialorder %v149_v11, 0.0 }
  0xf6   :  { %v154_v18 = vsel %vm152_vm3, %v149_v11, %v153_v16  ;;  %v263_v19 = vsel %vm261_vm2, %v258_v12, %v262_v17 }
  0xf7   :  { %v161_v20 = vmul.f32 %v295_v15, %v154_v18  ;;  %v264_v22 = vmul.f32 %v295_v15, %v263_v19 }
  0xf9   :  { %v162_v21 = vsel %vm78_vm1, %v161_v20, 0.0  ;;  %v265_v23 = vsel %vm78_vm1, %v264_v22, 0.0 }
  0xfa   :  { %163 = vadd.xlane.f32.xlu0 %v162_v21 }
  0xfe   :  { %266 = vadd.xlane.f32.xlu0 %v265_v23 }
 0x183   :  { %v164_v25 = vpop.xlane.xlu0 %163 }
 0x184   :  { %v171_v26 = vadd.f32 %v296_v24, %v164_v25 }
 0x186   :  { %vm172_vm4 = vcmp.ge.f32.partialorder %v171_v26, 0.0  ;;  %v173_v27 = vmul.f32 0.2, %v171_v26 }
 0x187   :  { %v267_v28 = vpop.xlane.xlu0 %266 }
 0x188   :  { %v174_v29 = vsel %vm172_vm4, %v171_v26, %v173_v27  ;;  %v268_v30 = vadd.f32 %v296_v24, %v267_v28 }
 0x189   :  { %v175_v31 = vand.u32 2147483647, %v174_v29  ;;  %vm179_vm7 = vcmp.ge.f32.partialorder %v174_v29, 0.0 }
 0x18a   :  { %vm269_vm5 = vcmp.ge.f32.partialorder %v268_v30, 0.0  ;;  %v270_v32 = vmul.f32 0.2, %v268_v30 }
 0x18b   :  { %v176_v33 = vsub.f32 0.0, %v175_v31 }
 0x18c   :  { %v271_v34 = vsel %vm269_vm5, %v268_v30, %v270_v32 }
 0x18d   :  { %v177_v35 = vmul.f32 1.442695, %v176_v33  ;;  %v272_v36 = vand.u32 2147483647, %v271_v34  ;;  %vm276_vm8 = vcmp.ge.f32.partialorder %v271_v34, 0.0 }
 0x18f   :  { %337 = vpow2.f32 %v177_v35  ;;  %v273_v37 = vsub.f32 0.0, %v272_v36 }
 0x191   :  { %v274_v38 = vmul.f32 1.442695, %v273_v37 }
 0x193   :  { %339 = vpow2.f32 %v274_v38 }
 0x19c   :  { %v338_v39 = vpop.eup %337 }
 0x19d   :  { %v180_v40 = vadd.f32 1.0, %v338_v39 }
 0x19f   :  { %341 = vrcp.f32 %v180_v40 }
 0x1a0   :  { %v340_v41 = vpop.eup %339 }
 0x1a1   :  { %v277_v42 = vadd.f32 1.0, %v340_v41 }
 0x1a3   :  { %343 = vrcp.f32 %v277_v42 }
 0x1ac   :  { %v342_v43 = vpop.eup %341 }
 0x1ad   :  { %v183_v44 = vmul.f32 %v342_v43, %v338_v39 }
 0x1af   :  { %v184_v45 = vsel %vm179_vm7, %v342_v43, %v183_v44 }
 0x1b0   :  { %v344_v46 = vpop.eup %343  ;;  %186 = vst.msk [vmem:[%s490_s6] sm:$0xff] %vm185_vm6, %v184_v45 }
 0x1b1   :  { %v280_v47 = vmul.f32 %v344_v46, %v340_v41 }
 0x1b3   :  { %v281_v48 = vsel %vm276_vm8, %v344_v46, %v280_v47 }
 0x1b4   :  { %282 = vst.msk [vmem:[%s491_s7] sm:$0xff] %vm185_vm6, %v281_v48 }
 0x1b5   :  { %291 = vsyncpa [#allocation4], 1 }
 0x1b6   :  { %292 = vsyncpa [#allocation6], 1 }

</bundles_post_ra>
